<compile_context>
chip_gen: v6e
topology: v6e:2x2x1
jax: 0.10.0
libtpu: 0.0.40
codegen_flags: <defaults>
</compile_context>

<pallas_src>
import jax
import jax.numpy as jnp
from jax.experimental import pallas as pl
from jax.experimental.pallas import tpu as pltpu


def _round_up(x: int, m: int) -> int:
    return ((x + m - 1) // m) * m


def decoder_b_kernel(x_ref, w1_ref, b1_ref, w2_ref, b2_ref, w3_ref, b3_ref, o_ref):
    """Fused 3-layer MLP. Matmuls in bf16 (f32 accumulation), activations in f32."""
    x = x_ref[...]  # [TB, Np] bf16

    # Layer 1: y = x @ W1^T + b1 ; LeakyReLU(0.2)
    h = jnp.dot(x, w1_ref[...], preferred_element_type=jnp.float32) + b1_ref[...]
    h = jnp.where(h > 0, h, 0.2 * h)

    # Layer 2
    h = jnp.dot(h.astype(w2_ref.dtype), w2_ref[...],
                preferred_element_type=jnp.float32) + b2_ref[...]
    h = jnp.where(h > 0, h, 0.2 * h)

    # Layer 3 (no activation)
    h = jnp.dot(h.astype(w3_ref.dtype), w3_ref[...],
                preferred_element_type=jnp.float32) + b3_ref[...]

    o_ref[...] = h.astype(o_ref.dtype)


def decoder_b_forward(x, params, *, batch_tile=256):
    """x: [B, N] float32. params: w1,b1,w2,b2,w3,b3 with weights pre-transposed
    ([in, out]) so the kernel computes y = x @ W.T + b like PyTorch Linear."""
    B, N = x.shape

    # Lane-dense feature dim (multiple of 128); batch tile (multiple of 8 sublanes).
    Np = _round_up(max(N, 128), 128)
    tb = min(batch_tile, _round_up(B, 8))
    Bp = _round_up(B, tb)

    def pad2(a, rows, cols):
        return jnp.pad(a, ((0, rows - a.shape[0]), (0, cols - a.shape[1])))

    # bf16 matmul operands (MXU-native), f32 biases.
    x_p = pad2(x, Bp, Np).astype(jnp.bfloat16)
    w1 = pad2(params["w1"], Np, Np).astype(jnp.bfloat16)
    w2 = pad2(params["w2"], Np, Np).astype(jnp.bfloat16)
    w3 = pad2(params["w3"], Np, Np).astype(jnp.bfloat16)
    b1 = pad2(params["b1"], 1, Np).astype(jnp.float32)
    b2 = pad2(params["b2"], 1, Np).astype(jnp.float32)
    b3 = pad2(params["b3"], 1, Np).astype(jnp.float32)

    x_spec = pl.BlockSpec((tb, Np), lambda i: (i, 0))
    w_spec = pl.BlockSpec((Np, Np), lambda i: (0, 0))   # resident across grid steps
    b_spec = pl.BlockSpec((1, Np), lambda i: (0, 0))
    o_spec = pl.BlockSpec((tb, Np), lambda i: (i, 0))

    # Right-size VMEM only if the footprint exceeds the scoped default.
    weight_bytes = 2 * (3 * Np * Np * 2)          # 3 bf16 weights, double-buffered
    io_bytes = 2 * tb * Np * (2 + 4)              # double-buffered bf16 in + f32 out
    vmem_need = weight_bytes + io_bytes + 3 * Np * 4
    vmem_limit = None
    if vmem_need > (24 << 20):
        vmem_limit = int(min(vmem_need + (8 << 20), 100 << 20))

    out = pl.pallas_call(
        decoder_b_kernel,
        out_shape=jax.ShapeDtypeStruct((Bp, Np), jnp.float32),
        grid=(Bp // tb,),
        in_specs=[x_spec, w_spec, b_spec, w_spec, b_spec, w_spec, b_spec],
        out_specs=o_spec,
        compiler_params=pltpu.CompilerParams(
            dimension_semantics=("parallel",),
            vmem_limit_bytes=vmem_limit,
        ),
    )(x_p, w1, b1, w2, b2, w3, b3)

    return out[:B, :N]


def make_params(key, num_inputs):
    """Mirror init_weights(): orthogonal weights (gain=1), zero biases."""
    def orthogonal(k, n):
        a = jax.random.normal(k, (n, n), dtype=jnp.float32)
        q, r = jnp.linalg.qr(a)
        q = q * jnp.sign(jnp.diag(r))[None, :]
        return q

    k1, k2, k3 = jax.random.split(key, 3)
    n = num_inputs
    # PyTorch Linear weight is [out, in]; store W.T ([in, out]) for x @ W.T.
    w1 = orthogonal(k1, n).T
    w2 = orthogonal(k2, n).T
    w3 = orthogonal(k3, n).T
    zeros = jnp.zeros((1, n), dtype=jnp.float32)
    return {"w1": w1, "b1": zeros, "w2": w2, "b2": zeros, "w3": w3, "b3": zeros}


def reference_forward(x, params):
    """Pure-JAX reference that emulates the kernel's bf16 matmul operands."""
    bf = lambda a: a.astype(jnp.bfloat16).astype(jnp.float32)
    h = bf(x) @ bf(params["w1"]) + params["b1"]
    h = jnp.where(h > 0, h, 0.2 * h)
    h = bf(h) @ bf(params["w2"]) + params["b2"]
    h = jnp.where(h > 0, h, 0.2 * h)
    h = bf(h) @ bf(params["w3"]) + params["b3"]
    return h


if __name__ == "__main__":
    key = jax.random.PRNGKey(0)
    k_x, k_p = jax.random.split(key)

    batch = 8
    num_inputs = 32

    x = jax.random.normal(k_x, (batch, num_inputs), dtype=jnp.float32)
    params = make_params(k_p, num_inputs)

    out = decoder_b_forward(x, params)
    out = jax.block_until_ready(out)

    ref = reference_forward(x, params)
    assert out.shape == (batch, num_inputs)
    assert jnp.allclose(out, ref, atol=1e-3, rtol=1e-3), "mismatch vs reference"

    print("KERNEL_OK")
</pallas_src>

<mosaic_0001>
module attributes {stable_mosaic.version = 11 : i64} {
  func.func @decoder_b_kernel(%arg0: i32, %arg1: memref<8x128xbf16, #tpu.memory_space<vmem>>, %arg2: memref<128x128xbf16, #tpu.memory_space<vmem>>, %arg3: memref<1x128xf32, #tpu.memory_space<vmem>>, %arg4: memref<128x128xbf16, #tpu.memory_space<vmem>>, %arg5: memref<1x128xf32, #tpu.memory_space<vmem>>, %arg6: memref<128x128xbf16, #tpu.memory_space<vmem>>, %arg7: memref<1x128xf32, #tpu.memory_space<vmem>>, %arg8: memref<8x128xf32, #tpu.memory_space<vmem>>) attributes {dimension_semantics = [#tpu.dimension_semantics<parallel>], iteration_bounds = array<i64: 1>, scalar_prefetch = 0 : i64, scratch_operands = 0 : i64, tpu.core_type = #tpu.core_type<tc>, window_params = [{transform_indices = @transform_0, window_bounds = array<i64: 8, 128>}, {pipeline_mode = #tpu.pipeline_mode<synchronous>, transform_indices = @transform_1, window_bounds = array<i64: 128, 128>}, {pipeline_mode = #tpu.pipeline_mode<synchronous>, transform_indices = @transform_2, window_bounds = array<i64: 1, 128>}, {pipeline_mode = #tpu.pipeline_mode<synchronous>, transform_indices = @transform_3, window_bounds = array<i64: 128, 128>}, {pipeline_mode = #tpu.pipeline_mode<synchronous>, transform_indices = @transform_4, window_bounds = array<i64: 1, 128>}, {pipeline_mode = #tpu.pipeline_mode<synchronous>, transform_indices = @transform_5, window_bounds = array<i64: 128, 128>}, {pipeline_mode = #tpu.pipeline_mode<synchronous>, transform_indices = @transform_6, window_bounds = array<i64: 1, 128>}, {transform_indices = @transform_7, window_bounds = array<i64: 8, 128>}]} {
    %c0 = arith.constant 0 : index
    %c0_0 = arith.constant 0 : index
    %0 = vector.load %arg1[%c0, %c0_0] : memref<8x128xbf16, #tpu.memory_space<vmem>>, vector<8x128xbf16>
    %c0_1 = arith.constant 0 : index
    %c0_2 = arith.constant 0 : index
    %1 = vector.load %arg2[%c0_1, %c0_2] : memref<128x128xbf16, #tpu.memory_space<vmem>>, vector<128x128xbf16>
    %cst = arith.constant dense<0.000000e+00> : vector<8x128xf32>
    %2 = tpu.matmul %0, %1, %cst {dimension_numbers = #tpu.dot_dimension_numbers<[1], [0], [0], [1], [0, 0, 1, 1], [], []>} : vector<8x128xbf16>, vector<128x128xbf16>, vector<8x128xf32> -> vector<8x128xf32>
    %c0_3 = arith.constant 0 : index
    %c0_4 = arith.constant 0 : index
    %3 = vector.load %arg3[%c0_3, %c0_4] : memref<1x128xf32, #tpu.memory_space<vmem>>, vector<1x128xf32>
    %4 = vector.broadcast %3 : vector<1x128xf32> to vector<8x128xf32>
    %5 = arith.addf %2, %4 : vector<8x128xf32>
    %cst_5 = arith.constant 0.000000e+00 : f32
    %6 = vector.broadcast %cst_5 : f32 to vector<8x128xf32>
    %7 = arith.cmpf ogt, %5, %6 : vector<8x128xf32>
    %cst_6 = arith.constant 2.000000e-01 : f32
    %8 = vector.broadcast %cst_6 : f32 to vector<8x128xf32>
    %9 = arith.mulf %8, %5 : vector<8x128xf32>
    %10 = arith.select %7, %5, %9 : vector<8x128xi1>, vector<8x128xf32>
    %11 = arith.truncf %10 : vector<8x128xf32> to vector<8x128xbf16>
    %c0_7 = arith.constant 0 : index
    %c0_8 = arith.constant 0 : index
    %12 = vector.load %arg4[%c0_7, %c0_8] : memref<128x128xbf16, #tpu.memory_space<vmem>>, vector<128x128xbf16>
    %cst_9 = arith.constant dense<0.000000e+00> : vector<8x128xf32>
    %13 = tpu.matmul %11, %12, %cst_9 {dimension_numbers = #tpu.dot_dimension_numbers<[1], [0], [0], [1], [0, 0, 1, 1], [], []>} : vector<8x128xbf16>, vector<128x128xbf16>, vector<8x128xf32> -> vector<8x128xf32>
    %c0_10 = arith.constant 0 : index
    %c0_11 = arith.constant 0 : index
    %14 = vector.load %arg5[%c0_10, %c0_11] : memref<1x128xf32, #tpu.memory_space<vmem>>, vector<1x128xf32>
    %15 = vector.broadcast %14 : vector<1x128xf32> to vector<8x128xf32>
    %16 = arith.addf %13, %15 : vector<8x128xf32>
    %cst_12 = arith.constant 0.000000e+00 : f32
    %17 = vector.broadcast %cst_12 : f32 to vector<8x128xf32>
    %18 = arith.cmpf ogt, %16, %17 : vector<8x128xf32>
    %cst_13 = arith.constant 2.000000e-01 : f32
    %19 = vector.broadcast %cst_13 : f32 to vector<8x128xf32>
    %20 = arith.mulf %19, %16 : vector<8x128xf32>
    %21 = arith.select %18, %16, %20 : vector<8x128xi1>, vector<8x128xf32>
    %22 = arith.truncf %21 : vector<8x128xf32> to vector<8x128xbf16>
    %c0_14 = arith.constant 0 : index
    %c0_15 = arith.constant 0 : index
    %23 = vector.load %arg6[%c0_14, %c0_15] : memref<128x128xbf16, #tpu.memory_space<vmem>>, vector<128x128xbf16>
    %cst_16 = arith.constant dense<0.000000e+00> : vector<8x128xf32>
    %24 = tpu.matmul %22, %23, %cst_16 {dimension_numbers = #tpu.dot_dimension_numbers<[1], [0], [0], [1], [0, 0, 1, 1], [], []>} : vector<8x128xbf16>, vector<128x128xbf16>, vector<8x128xf32> -> vector<8x128xf32>
    %c0_17 = arith.constant 0 : index
    %c0_18 = arith.constant 0 : index
    %25 = vector.load %arg7[%c0_17, %c0_18] : memref<1x128xf32, #tpu.memory_space<vmem>>, vector<1x128xf32>
    %26 = vector.broadcast %25 : vector<1x128xf32> to vector<8x128xf32>
    %27 = arith.addf %24, %26 : vector<8x128xf32>
    %c0_19 = arith.constant 0 : index
    %c0_20 = arith.constant 0 : index
    %28 = vector.load %arg8[%c0_19, %c0_20] : memref<8x128xf32, #tpu.memory_space<vmem>>, vector<8x128xf32>
    tpu.vector_store %arg8[%c0_19, %c0_20], %27 {strides = array<i32>} : memref<8x128xf32, #tpu.memory_space<vmem>>, vector<8x128xf32>,
    return
  }
  func.func @transform_0(%arg0: i32) -> (i32, i32) {
    %c0_i32 = arith.constant 0 : i32
    %c0_i32_0 = arith.constant 0 : i32
    return %arg0, %c0_i32 : i32, i32
  }
  func.func @transform_1(%arg0: i32) -> (i32, i32) {
    %c0_i32 = arith.constant 0 : i32
    %c0_i32_0 = arith.constant 0 : i32
    %c0_i32_1 = arith.constant 0 : i32
    return %c0_i32, %c0_i32_0 : i32, i32
  }
  func.func @transform_2(%arg0: i32) -> (i32, i32) {
    %c0_i32 = arith.constant 0 : i32
    %c0_i32_0 = arith.constant 0 : i32
    %c0_i32_1 = arith.constant 0 : i32
    return %c0_i32, %c0_i32_0 : i32, i32
  }
  func.func @transform_3(%arg0: i32) -> (i32, i32) {
    %c0_i32 = arith.constant 0 : i32
    %c0_i32_0 = arith.constant 0 : i32
    %c0_i32_1 = arith.constant 0 : i32
    return %c0_i32, %c0_i32_0 : i32, i32
  }
  func.func @transform_4(%arg0: i32) -> (i32, i32) {
    %c0_i32 = arith.constant 0 : i32
    %c0_i32_0 = arith.constant 0 : i32
    %c0_i32_1 = arith.constant 0 : i32
    return %c0_i32, %c0_i32_0 : i32, i32
  }
  func.func @transform_5(%arg0: i32) -> (i32, i32) {
    %c0_i32 = arith.constant 0 : i32
    %c0_i32_0 = arith.constant 0 : i32
    %c0_i32_1 = arith.constant 0 : i32
    return %c0_i32, %c0_i32_0 : i32, i32
  }
  func.func @transform_6(%arg0: i32) -> (i32, i32) {
    %c0_i32 = arith.constant 0 : i32
    %c0_i32_0 = arith.constant 0 : i32
    %c0_i32_1 = arith.constant 0 : i32
    return %c0_i32, %c0_i32_0 : i32, i32
  }
  func.func @transform_7(%arg0: i32) -> (i32, i32) {
    %c0_i32 = arith.constant 0 : i32
    %c0_i32_0 = arith.constant 0 : i32
    return %arg0, %c0_i32 : i32, i32
  }
}

</mosaic_0001>

<bundles_post_ra>
// kernel: tpu_custom_call.1
= control target key start
LH: loop header
LB: loop body
LE: loop exit
PB: predicated region body
PF: predicated region fallthrough
CT: control target
= control target key end

     0   :  { %12 = vsyncpa [#allocation3], 0  ;;  %s808_s0 = inlined_call_operand.hbm [shape: bf16[8,128], index: 0, kind: input, shape index: {}]   ;;  %s809_s1 = inlined_call_operand.hbm [shape: bf16[128,128], index: 1, kind: input, shape index: {}]   ;;  %s810_s2 = inlined_call_operand.vmem [shape: f32[1,128], index: 2, kind: input, shape index: {}]   ;;  %s811_s3 = inlined_call_operand.hbm [shape: bf16[128,128], index: 3, kind: input, shape index: {}]   ;;  %s812_s4 = inlined_call_operand.vmem [shape: f32[1,128], index: 4, kind: input, shape index: {}]   ;;  %s813_s5 = inlined_call_operand.hbm [shape: bf16[128,128], index: 5, kind: input, shape index: {}]   ;;  %s814_s6 = inlined_call_operand.vmem [shape: f32[1,128], index: 6, kind: input, shape index: {}]   ;;  %s815_s7 = inlined_call_operand.hbm [shape: f32[8,128], index: 7, kind: output, shape index: {}]  }
   0x1   :  { %13 = vsyncpa [#allocation6], 0 }
   0x2   :  { %14 = vsyncpa [#allocation9], 0 }
   0x3   :  { %15 = vsyncpa [#allocation4], 0  ;;  %s696_s24 = smov [#allocation5]  }
   0x4   :  { %s31_s25 = sshll.u32 %s696_s24, 4  ;;  %s32_s25 = int_to_ptr.vmem [resolvable:$true] %s31_s25 }
   0x5   :  { %s596_s26 = scalar_lea.vmem %s32_s25, 1024  ;;  %p601_p1 = scmp.lt.s32.totalorder %s32_s25, %s32_s25 }
   0x6   :  { %p597_p0 = scmp.ne.s32.totalorder %s32_s25, %s596_s26  ;;  %p602_p2 = scmp.lt.s32.totalorder %s596_s26, %s596_s26 }
   0x8   :  { %p603_p3 = por %p602_p2, %p601_p1 }
   0xa   :  { %p604_p4 = pnand %p603_p3, %p597_p0 }
   0xc   :  { %607 = shalt.err (!%p604_p4)
}
   0xd   :  { %s697_s27 = smov 64   ;;  %s698_s28 = smov 4  }
   0xe   :  { %37 = dma.hbm_to_vmem [thread:$0]  %s809_s1, 1024, %s32_s25, [#allocation6], %s697_s27, %s697_s27, %s698_s28  }
   0xf   :  { %s699_s8 = smov [#allocation2]   ;;  %s700_s10 = smov [#allocation7]  }
  0x10   :  { %s22_s9 = sshll.u32 %s699_s8, 4  ;;  %s45_s11 = sshll.u32 %s700_s10, 4  ;;  %s23_s9 = int_to_ptr.vmem [resolvable:$true] %s22_s9  ;;  %s46_s11 = int_to_ptr.vmem [resolvable:$true] %s45_s11 }
  0x11   :  { %s616_s12 = scalar_lea.vmem %s23_s9, 64  ;;  %p621_p6 = scmp.lt.s32.totalorder %s23_s9, %s23_s9 }
  0x12   :  { %p617_p5 = scmp.ne.s32.totalorder %s23_s9, %s616_s12  ;;  %p622_p7 = scmp.lt.s32.totalorder %s616_s12, %s616_s12 }
  0x14   :  { %p623_p8 = por %p622_p7, %p621_p6 }
  0x16   :  { %p624_p9 = pnand %p623_p8, %p617_p5 }
  0x18   :  { %627 = shalt.err (!%p624_p9)
}
  0x19   :  { %25 = dma.hbm_to_vmem [thread:$0]  %s808_s0, 64, %s23_s9, [#allocation3]  }
  0x1a   :  { %s636_s15 = scalar_lea.vmem %s46_s11, 1024  ;;  %p641_p11 = scmp.lt.s32.totalorder %s46_s11, %s46_s11 }
  0x1b   :  { %p637_p10 = scmp.ne.s32.totalorder %s46_s11, %s636_s15  ;;  %p642_p12 = scmp.lt.s32.totalorder %s636_s15, %s636_s15 }
  0x1d   :  { %p643_p13 = por %p642_p12, %p641_p11 }
  0x1f   :  { %p644_p0 = pnand %p643_p13, %p637_p10 }
  0x21   :  { %647 = shalt.err (!%p644_p0)
}
  0x22   :  { %51 = dma.hbm_to_vmem [thread:$0]  %s811_s3, 1024, %s46_s11, [#allocation6], %s697_s27, %s697_s27, %s698_s28  }
  0x23   :  { %s701_s17 = smov [#allocation8]  }
  0x24   :  { %s59_s18 = sshll.u32 %s701_s17, 4  ;;  %s60_s18 = int_to_ptr.vmem [resolvable:$true] %s59_s18 }
  0x25   :  { %s656_s19 = scalar_lea.vmem %s60_s18, 1024  ;;  %p661_p2 = scmp.lt.s32.totalorder %s60_s18, %s60_s18 }
  0x26   :  { %p657_p1 = scmp.ne.s32.totalorder %s60_s18, %s656_s19  ;;  %p662_p3 = scmp.lt.s32.totalorder %s656_s19, %s656_s19 }
  0x28   :  { %p663_p4 = por %p662_p3, %p661_p2 }
  0x2a   :  { %p664_p5 = pnand %p663_p4, %p657_p1 }
  0x2c   :  { %667 = shalt.err (!%p664_p5)
}
  0x2d   :  { %65 = dma.hbm_to_vmem [thread:$0]  %s813_s5, 1024, %s60_s18, [#allocation9], %s697_s27, %s697_s27, %s698_s28  }
  0x2e   :  { %688 = dma.done.wait [#allocation3], 64  }
  0x2f   :  { %689 = vsyncadd [#allocation3], 4294967232 }
  0x30   :  { %690 = dma.done.wait [#allocation6], 2048  }
  0x31   :  { %691 = vsyncadd [#allocation6], 4294965248 }
  0x32   :  { %692 = dma.done.wait [#allocation9], 1024  }
  0x33   :  { %693 = vsyncadd [#allocation9], 4294966272  ;;  %v702_v0 = vmov 0.0   ;;  %vm703_vm0 = vmmov 0   ;;  %v564_v1 = vld [vmem:[#allocation5 + $0x38] sm:$0xff]   ;;  %v565_v2 = vld [vmem:[#allocation5 + $0x30] sm:$0xff]  }
  0x34   :  { %495 = vmatprep.subr.bf16.mxu0 %v702_v0  ;;  %511 = vmatprep.mubr.msk.bf16.mxu0 %vm703_vm0, %v702_v0  ;;  %v566_v3 = vld [vmem:[#allocation5 + $0x28] sm:$0xff]   ;;  %v572_v4 = vld [vmem:[#allocation7 + $0x38] sm:$0xff]   ;;  %v567_v5 = vld [vmem:[#allocation5 + $0x20] sm:$0xff]   ;;  %s704_s24 = smov [#allocation10]  }
  0x35   :  { %515 = vmatprep.subr.bf16.mxu1 %v702_v0  ;;  %531 = vmatprep.mubr.msk.bf16.mxu1 %vm703_vm0, %v702_v0  ;;  %v573_v6 = vld [vmem:[#allocation7 + $0x30] sm:$0xff]   ;;  %v568_v7 = vld [vmem:[#allocation5 + $0x18] sm:$0xff]   ;;  %v574_v8 = vld [vmem:[#allocation7 + $0x28] sm:$0xff]   ;;  %s430_s25 = sshll.u32 %s704_s24, 4  ;;  %s431_s25 = int_to_ptr.vmem [resolvable:$true] %s430_s25 }
  0x36   :  { %496 = vmatpush3.bf16.msra.mxu0 %v564_v1  ;;  %516 = vmatpush3.bf16.msra.mxu1 %v572_v4  ;;  %v569_v9 = vld [vmem:[#allocation5 + $0x10] sm:$0xff]   ;;  %v575_v10 = vld [vmem:[#allocation7 + $0x20] sm:$0xff]   ;;  %v570_v11 = vld [vmem:[#allocation5 + $0x8] sm:$0xff]   ;;  %p673_p7 = scmp.lt.s32.totalorder %s431_s25, %s431_s25 }
  0x37   :  { %497 = vmatprep.subr.bf16.mxu0 %v702_v0  ;;  %517 = vmatprep.subr.bf16.mxu1 %v702_v0  ;;  %v576_v12 = vld [vmem:[#allocation7 + $0x18] sm:$0xff]   ;;  %v571_v13 = vld [vmem:[#allocation5] sm:$0xff]   ;;  %v577_v14 = vld [vmem:[#allocation7 + $0x10] sm:$0xff]  }
  0x38   :  { %v81_v15 = vld [vmem:[#allocation2] sm:$0xf]  ;;  %v578_v16 = vld [vmem:[#allocation7 + $0x8] sm:$0xff]   ;;  %v579_v17 = vld [vmem:[#allocation7] sm:$0xff]  }
  0x39   :  { %v580_v18 = vld [vmem:[#allocation8 + $0x38] sm:$0xff]   ;;  %v581_v19 = vld [vmem:[#allocation8 + $0x30] sm:$0xff]   ;;  %v582_v20 = vld [vmem:[#allocation8 + $0x28] sm:$0xff]  }
  0x3a   :  { %498 = vmatpush3.bf16.msra.mxu0 %v565_v2  ;;  %518 = vmatpush3.bf16.msra.mxu1 %v573_v6  ;;  %v583_v21 = vld [vmem:[#allocation8 + $0x20] sm:$0xff]   ;;  %v584_v22 = vld [vmem:[#allocation8 + $0x18] sm:$0xff]   ;;  %v585_v23 = vld [vmem:[#allocation8 + $0x10] sm:$0xff]  }
  0x3b   :  { %499 = vmatprep.subr.bf16.mxu0 %v702_v0  ;;  %519 = vmatprep.subr.bf16.mxu1 %v702_v0  ;;  %v441_v24 = vld [vmem:[%s810_s2] ss:$0 sm:$0xff]  ;;  %v586_v33 = vld [vmem:[#allocation8 + $0x8] sm:$0xff]   ;;  %v587_v34 = vld [vmem:[#allocation8] sm:$0xff]  }
  0x3c   :  { %v450_v35 = vld [vmem:[%s812_s4] ss:$0 sm:$0xff]  ;;  %s668_s4 = scalar_lea.vmem %s431_s25, 128 }
  0x3d   :  { %v459_v44 = vld [vmem:[%s814_s6] ss:$0 sm:$0xff]  ;;  %p669_p6 = scmp.ne.s32.totalorder %s431_s25, %s668_s4  ;;  %p674_p8 = scmp.lt.s32.totalorder %s668_s4, %s668_s4 }
  0x3e   :  { %500 = vmatpush3.bf16.msra.mxu0 %v566_v3  ;;  %520 = vmatpush3.bf16.msra.mxu1 %v574_v8 }
  0x3f   :  { %501 = vmatprep.subr.bf16.mxu0 %v702_v0  ;;  %521 = vmatprep.subr.bf16.mxu1 %v702_v0  ;;  %p675_p9 = por %p674_p8, %p673_p7 }
  0x41   :  { %p676_p10 = pnand %p675_p9, %p669_p6 }
  0x42   :  { %502 = vmatpush3.bf16.msra.mxu0 %v567_v5  ;;  %522 = vmatpush3.bf16.msra.mxu1 %v575_v10 }
  0x43   :  { %503 = vmatprep.subr.bf16.mxu0 %v702_v0  ;;  %523 = vmatprep.subr.bf16.mxu1 %v702_v0 }
  0x46   :  { %504 = vmatpush3.bf16.msra.mxu0 %v568_v7  ;;  %524 = vmatpush3.bf16.msra.mxu1 %v576_v12 }
  0x47   :  { %505 = vmatprep.subr.bf16.mxu0 %v702_v0  ;;  %525 = vmatprep.subr.bf16.mxu1 %v702_v0 }
  0x4a   :  { %506 = vmatpush3.bf16.msra.mxu0 %v569_v9  ;;  %526 = vmatpush3.bf16.msra.mxu1 %v577_v14 }
  0x4b   :  { %507 = vmatprep.subr.bf16.mxu0 %v702_v0  ;;  %527 = vmatprep.subr.bf16.mxu1 %v702_v0 }
  0x4e   :  { %508 = vmatpush3.bf16.msra.mxu0 %v570_v11  ;;  %528 = vmatpush3.bf16.msra.mxu1 %v578_v16 }
  0x4f   :  { %509 = vmatprep.subr.bf16.mxu0 %v702_v0  ;;  %529 = vmatprep.subr.bf16.mxu1 %v702_v0 }
  0x52   :  { %510 = vmatpush3.bf16.msra.mxu0 %v571_v13  ;;  %530 = vmatpush3.bf16.msra.mxu1 %v579_v17 }
  0x53   :  { %535 = vmatprep.subr.bf16.mxu0 %v702_v0 }
  0x55   :  { %512 = vmatmul.mubr.bf16.vlgmr.msra.gmra.mxu0 %v81_v15 }
  0x56   :  { %551 = vmatprep.mubr.msk.bf16.mxu0 %vm703_vm0, %v702_v0  ;;  %536 = vmatpush3.bf16.msra.mxu0 %v580_v18 }
  0x57   :  { %537 = vmatprep.subr.bf16.mxu0 %v702_v0 }
  0x5a   :  { %538 = vmatpush3.bf16.msra.mxu0 %v581_v19 }
  0x5b   :  { %539 = vmatprep.subr.bf16.mxu0 %v702_v0 }
  0x5e   :  { %540 = vmatpush3.bf16.msra.mxu0 %v582_v20 }
  0x5f   :  { %541 = vmatprep.subr.bf16.mxu0 %v702_v0 }
  0x62   :  { %542 = vmatpush3.bf16.msra.mxu0 %v583_v21 }
  0x63   :  { %543 = vmatprep.subr.bf16.mxu0 %v702_v0 }
  0x66   :  { %544 = vmatpush3.bf16.msra.mxu0 %v584_v22 }
  0x67   :  { %545 = vmatprep.subr.bf16.mxu0 %v702_v0 }
  0x6a   :  { %546 = vmatpush3.bf16.msra.mxu0 %v585_v23 }
  0x6b   :  { %547 = vmatprep.subr.bf16.mxu0 %v702_v0 }
  0x6e   :  { %548 = vmatpush3.bf16.msra.mxu0 %v586_v33 }
  0x6f   :  { %549 = vmatprep.subr.bf16.mxu0 %v702_v0 }
  0x72   :  { %550 = vmatpush3.bf16.msra.mxu0 %v587_v34 }
 0x115   :  { %v187_v25 = vpop.f32.mrf.mxu0 }
 0x116   :  { %v188_v26 = vadd.f32 %v441_v24, %v187_v25 }
 0x117   :  { %v513_v27 = vpop.f32.mrf.mxu0 }
 0x118   :  { %vm193_vm1 = vcmp.gt.f32.partialorder %v188_v26, 0.0  ;;  %v194_v28 = vmul.f32 0.2, %v188_v26 }
 0x119   :  { %v190_v29 = vpop.f32.mrf.mxu0 }
 0x11a   :  { %v195_v30 = vsel %vm193_vm1, %v188_v26, %v194_v28 }
 0x11b   :  { %v514_v31 = vpop.f32.mrf.mxu0  ;;  %v196_v32 = vpack.c.bf16 %v195_v30, %v195_v30 }
 0x11d   :  { %532 = vmatmul.mubr.bf16.vlgmr.msra.gmra.mxu1 %v196_v32 }
 0x1dd   :  { %v302_v36 = vpop.f32.mrf.mxu1 }
 0x1de   :  { %v303_v37 = vadd.f32 %v450_v35, %v302_v36 }
 0x1df   :  { %v533_v38 = vpop.f32.mrf.mxu1 }
 0x1e0   :  { %vm308_vm2 = vcmp.gt.f32.partialorder %v303_v37, 0.0  ;;  %v309_v39 = vmul.f32 0.2, %v303_v37 }
 0x1e1   :  { %v305_v40 = vpop.f32.mrf.mxu1 }
 0x1e2   :  { %v310_v41 = vsel %vm308_vm2, %v303_v37, %v309_v39 }
 0x1e3   :  { %v311_v42 = vpack.c.bf16 %v310_v41, %v310_v41  ;;  %v534_v43 = vpop.f32.mrf.mxu1 }
 0x1e5   :  { %552 = vmatmul.mubr.bf16.vlgmr.msra.gmra.mxu0 %v311_v42 }
 0x2a5   :  { %v417_v45 = vpop.f32.mrf.mxu0 }
 0x2a6   :  { %v418_v46 = vadd.f32 %v459_v44, %v417_v45 }
 0x2a7   :  { %v553_v47 = vpop.f32.mrf.mxu0 }
 0x2a8   :  { %423 = vst [vmem:[#allocation10] sm:$0xff] %v418_v46 }
 0x2a9   :  { %v420_v48 = vpop.f32.mrf.mxu0 }
 0x2aa   :  { %679 = shalt.err (!%p676_p10)
}
 0x2ab   :  { %433 = dma.vmem_to_hbm [thread:$0]  %s431_s25, 128, %s815_s7, [#allocation4]   ;;  %v554_v49 = vpop.f32.mrf.mxu0 }
 0x2ac   :  { %694 = dma.done.wait [#allocation4], 128  }
 0x2ad   :  { %695 = vsyncadd [#allocation4], 4294967168 }
 0x2ae   :  { %437 = vsyncpa [#allocation3], 1 }
 0x2af   :  { %438 = vsyncpa [#allocation6], 1 }
 0x2b0   :  { %439 = vsyncpa [#allocation9], 1 }
 0x2b1   :  { %440 = vsyncpa [#allocation4], 1 }

</bundles_post_ra>
